<compile_context>
chip_gen: v5e
topology: v5e:2x2
jax: 0.10.0
libtpu: 0.0.40
codegen_flags: <defaults>
</compile_context>

<pallas_src>
import functools

import jax
import jax.numpy as jnp
from jax.experimental import pallas as pl
from jax.experimental.pallas import tpu as pltpu

_LANE = 128      # vreg lane width    -> pad the class/output dim to this
_SUBLANE = 8     # vreg sublane width -> pad the batch dim to this


def _fc_direct_kernel(x_ref, wt_ref, b_ref, o_ref):
    # x_ref:  (Bp, C)            activations
    # wt_ref: (C, CLASSES_PAD)   weight, pre-transposed + zero-padded (dense RHS tile)
    # b_ref:  (1, CLASSES_PAD)   bias (zero-padded)
    # o_ref:  (Bp, CLASSES_PAD)  lane-dense output
    acc = jnp.dot(x_ref[...], wt_ref[...], preferred_element_type=jnp.float32)
    o_ref[...] = (acc + b_ref[...]).astype(o_ref.dtype)


def make_padded_params(weight, bias):
    """One-time 'module init' prep: reshape + transpose + pad Conv2d params.

    weight: (classes, C, 1, 1) float32   (Conv2d weight layout)
    bias:   (classes,) float32
    returns (wt_pad, b_pad2d) with shapes (C, classes_pad), (1, classes_pad).
    """
    classes, C = weight.shape[0], weight.shape[1]
    classes_pad = pl.cdiv(classes, _LANE) * _LANE
    wt_pad = jnp.pad(weight.reshape(classes, C).T,           # (C, classes)
                     ((0, 0), (0, classes_pad - classes)))   # -> (C, classes_pad)
    b_pad2d = jnp.pad(bias, (0, classes_pad - classes)).reshape(1, classes_pad)
    return wt_pad, b_pad2d


@functools.partial(jax.jit, static_argnames=("classes",))
def _forward_padded(x_nchw, wt_pad, b_pad2d, *, classes):
    """Per-call path: x reshape/pad -> pallas_call -> slice. All fused under jit."""
    B, C, H, W = x_nchw.shape
    assert H == 1 and W == 1, "view(B, classes) requires 1x1 spatial dims"
    classes_pad = wt_pad.shape[1]
    b_pad = pl.cdiv(B, _SUBLANE) * _SUBLANE

    x2d = x_nchw.reshape(B, C)                       # squeeze spatial dims
    if b_pad != B:
        x2d = jnp.pad(x2d, ((0, b_pad - B), (0, 0)))

    out_padded = pl.pallas_call(
        _fc_direct_kernel,
        out_shape=jax.ShapeDtypeStruct((b_pad, classes_pad), x2d.dtype),
        # No grid: single invocation, whole arrays resident in VMEM.
        in_specs=[
            pl.BlockSpec(memory_space=pltpu.MemorySpace.VMEM),
            pl.BlockSpec(memory_space=pltpu.MemorySpace.VMEM),
            pl.BlockSpec(memory_space=pltpu.MemorySpace.VMEM),
        ],
        out_specs=pl.BlockSpec(memory_space=pltpu.MemorySpace.VMEM),
        cost_estimate=pl.CostEstimate(
            flops=2 * b_pad * C * classes_pad,
            transcendentals=0,
            bytes_accessed=4 * (b_pad * C + C * classes_pad
                                + classes_pad + b_pad * classes_pad),
        ),
    )(x2d, wt_pad, b_pad2d)

    xm = out_padded[:B, :classes]                    # fuses under jit
    # TODO(synk): if B/C ever scale, re-tile with a grid parallel over B
    # (v7x has 2 TCs) and budget tiles against 64 MiB physical / 16 MiB (v5e)
    # scoped VMEM, or raise vmem_limit_bytes via pltpu.CompilerParams.
    return xm, jnp.zeros((1,), dtype=jnp.float32)


def net_vanilla_nn_crank_forward(x_nchw, weight, bias):
    """Forward pass of Net_vanilla_NN_crank (eager convenience wrapper).

    x_nchw: (B, C, 1, 1) float32
    weight: (classes, C, 1, 1) float32
    bias:   (classes,) float32
    returns (xm, zeros(1)) with xm of shape (B, classes)

    For repeated calls, precompute (wt_pad, b_pad2d) = make_padded_params(...)
    once and call _forward_padded directly.
    """
    classes = weight.shape[0]
    wt_pad, b_pad2d = make_padded_params(weight, bias)
    return _forward_padded(x_nchw, wt_pad, b_pad2d, classes=classes)


if __name__ == "__main__":
    key = jax.random.PRNGKey(0)
    kx, kw, kb = jax.random.split(key, 3)

    # Small shapes consistent with the forward: .view(B, classes) forces 1x1 spatial.
    B, C, classes = 8, 4, 10
    x = jax.random.normal(kx, (B, C, 1, 1), dtype=jnp.float32)
    weight = jax.random.normal(kw, (classes, C, 1, 1), dtype=jnp.float32) * 0.1
    bias = jax.random.normal(kb, (classes,), dtype=jnp.float32) * 0.1

    # "Module init": pad/transpose params once, outside the per-call path.
    wt_pad, b_pad2d = make_padded_params(weight, bias)

    xm, aux = _forward_padded(x, wt_pad, b_pad2d, classes=classes)
    jax.block_until_ready((xm, aux))

    # sanity check against plain-JAX reference
    ref = x.reshape(B, C) @ weight.reshape(classes, C).T + bias
    assert xm.shape == (B, classes)
    assert aux.shape == (1,)
    assert jnp.allclose(xm, ref, atol=1e-5, rtol=1e-5)

    print("KERNEL_OK")
</pallas_src>

<mosaic_0001>
module attributes {stable_mosaic.version = 11 : i64} {
  func.func @_fc_direct_kernel(%arg0: memref<8x4xf32, #tpu.memory_space<vmem>>, %arg1: memref<4x128xf32, #tpu.memory_space<vmem>>, %arg2: memref<1x128xf32, #tpu.memory_space<vmem>>, %arg3: memref<8x128xf32, #tpu.memory_space<vmem>>) attributes {dimension_semantics = [], scalar_prefetch = 0 : i64, scratch_operands = 0 : i64, tpu.core_type = #tpu.core_type<tc>} {
    %c0 = arith.constant 0 : index
    %c0_0 = arith.constant 0 : index
    %0 = vector.load %arg0[%c0, %c0_0] : memref<8x4xf32, #tpu.memory_space<vmem>>, vector<8x4xf32>
    %c0_1 = arith.constant 0 : index
    %c0_2 = arith.constant 0 : index
    %1 = vector.load %arg1[%c0_1, %c0_2] : memref<4x128xf32, #tpu.memory_space<vmem>>, vector<4x128xf32>
    %cst = arith.constant dense<0.000000e+00> : vector<8x128xf32>
    %2 = tpu.matmul %0, %1, %cst {dimension_numbers = #tpu.dot_dimension_numbers<[1], [0], [0], [1], [0, 0, 1, 1], [], []>} : vector<8x4xf32>, vector<4x128xf32>, vector<8x128xf32> -> vector<8x128xf32>
    %c0_3 = arith.constant 0 : index
    %c0_4 = arith.constant 0 : index
    %3 = vector.load %arg2[%c0_3, %c0_4] : memref<1x128xf32, #tpu.memory_space<vmem>>, vector<1x128xf32>
    %4 = vector.broadcast %3 : vector<1x128xf32> to vector<8x128xf32>
    %5 = arith.addf %2, %4 : vector<8x128xf32>
    %c0_5 = arith.constant 0 : index
    %c0_6 = arith.constant 0 : index
    %6 = vector.load %arg3[%c0_5, %c0_6] : memref<8x128xf32, #tpu.memory_space<vmem>>, vector<8x128xf32>
    tpu.vector_store %arg3[%c0_5, %c0_6], %5 {strides = array<i32>} : memref<8x128xf32, #tpu.memory_space<vmem>>, vector<8x128xf32>,
    return
  }
}

</mosaic_0001>

<bundles_post_ra>
// kernel: _forward_padded.1
= control target key start
LH: loop header
LB: loop body
LE: loop exit
PB: predicated region body
PF: predicated region fallthrough
CT: control target
= control target key end

     0   :  { %vm25_vm0 = vcmask 1043456   ;;  %vm21_vm1 = vcmask 31744   ;;  %s129_s0 = inlined_call_operand.vmem [shape: f32[8,4], index: 0, kind: input, shape index: {}]   ;;  %s130_s1 = inlined_call_operand.vmem [shape: f32[4,128], index: 1, kind: input, shape index: {}]   ;;  %s131_s2 = inlined_call_operand.vmem [shape: f32[1,128], index: 2, kind: input, shape index: {}]   ;;  %s132_s3 = inlined_call_operand.hbm [shape: f32[8,128], index: 3, kind: output, shape index: {}]  }
   0x1   :  { %v16_v0 = vld [vmem:[%s130_s1] sm:$0xf] }
   0x2   :  { %v15_v1 = vld [vmem:[%s129_s0] sm:$0xff]  ;;  %66 = vmatpush.msk.msra.mxu0 %vm25_vm0, %v16_v0 }
   0x3   :  { %8 = vsyncpa [#allocation3], 0  ;;  %67 = vmatmul.msk.f32.vlgmr.msra.gmra.mxu0 %vm21_vm1, %v15_v1  ;;  %v69_v2 = vld [vmem:[%s131_s2] ss:$0 sm:$0xff]  ;;  %s96_s18 = smov [#allocation2]   ;;  %s57_s22 = sshll.u32 %s132_s3, 4  ;;  %s58_s22 = int_to_ptr.hbm [resolvable:$true] %s57_s22 }
   0x4   :  { %s55_s19 = sshll.u32 %s96_s18, 4  ;;  %s56_s19 = int_to_ptr.vmem [resolvable:$true] %s55_s19 }
  0x80   :  { %v46_v3 = vpop.f32.mrf.mxu0 }
  0x81   :  { %v47_v4 = vadd.f32 %v69_v2, %v46_v3 }
  0x83   :  { %49 = vst [vmem:[#allocation2] sm:$0xff] %v47_v4 }
  0x84   :  { %60 = dma.vmem_to_hbm [thread:$0]  %s56_s19, 128, %s58_s22, [#allocation3]  }
  0x85   :  { %94 = dma.done.wait [#allocation3], 128  }
  0x86   :  { %95 = vsyncadd [#allocation3], 4294967168 }
  0x87   :  { %65 = vsyncpa [#allocation3], 1 }

</bundles_post_ra>
